<compile_context>
chip_gen: v7x
topology: tpu7x:2x2x1
jax: 0.10.0
libtpu: 0.0.40
codegen_flags: <defaults>
</compile_context>

<pallas_src>
import functools

import jax
import jax.numpy as jnp
from jax.experimental import pallas as pl
from jax.experimental.pallas import tpu as pltpu


def _rmsnorm_kernel(x_ref, g_ref, o_ref, *, c_scale, eps):
    """One (batch, spatial-tile) step: x_ref block (1, C, TL), g_ref (C, 1)."""
    f32 = jnp.float32
    x = x_ref[0].astype(f32)                        # (C, TL): C sublanes, TL lanes
    ss = jnp.sum(x * x, axis=0, keepdims=True)      # (1, TL) reduce over channels
    denom = jnp.maximum(jnp.sqrt(ss), eps)          # clamp like F.normalize(eps=1e-12)
    inv = pl.reciprocal(denom, approx=False)        # EUP reciprocal, exact
    g = g_ref[...].astype(f32) * c_scale            # (C, 1), sqrt(C) folded in
    o_ref[0] = (x * inv * g).astype(o_ref.dtype)    # lane-dense unmasked store


def _lane_tile(L, C, itemsize, budget_bytes=2 << 20):
    """Largest lane tile that is a multiple of 128, divides L, fits the budget."""
    if L % 128 != 0 or L * C * itemsize <= budget_bytes:
        return L                                    # full extent is always legal
    tl = max((budget_bytes // (C * itemsize)) // 128 * 128, 128)
    tl = min(tl, L)
    while L % tl != 0:                              # 128 always divides L here
        tl -= 128
    return tl


@functools.partial(jax.jit, static_argnames=("eps",))
def rms_norm(x_nchw, g, *, eps=1e-12):
    """RMSNorm over the channel dim. x_nchw: (B, C, H, W); g: (1, C, 1, 1)."""
    B, C, H, W = x_nchw.shape
    L = H * W
    TL = _lane_tile(L, C, jnp.dtype(jnp.float32).itemsize)

    x2 = x_nchw.reshape(B, C, L)                    # no-copy view; spatial -> lanes
    g2 = g.reshape(C, 1)                            # per-channel scale, (C, 1)

    kernel = functools.partial(
        _rmsnorm_kernel, c_scale=float(C) ** 0.5, eps=float(eps))

    out = pl.pallas_call(
        kernel,
        out_shape=jax.ShapeDtypeStruct((B, C, L), x_nchw.dtype),
        grid_spec=pltpu.PrefetchScalarGridSpec(
            num_scalar_prefetch=0,
            grid=(B, L // TL),
            in_specs=[
                pl.BlockSpec((1, C, TL), lambda b, l: (b, 0, l)),
                pl.BlockSpec((C, 1), lambda b, l: (0, 0)),
            ],
            out_specs=pl.BlockSpec((1, C, TL), lambda b, l: (b, 0, l)),
        ),
        compiler_params=pltpu.CompilerParams(
            dimension_semantics=("parallel", "parallel")),
    )(x2, g2)

    return out.reshape(B, C, H, W)


def _ref_rmsnorm(x, g, eps=1e-12):
    """Pure-JAX reference matching F.normalize(x, dim=1) * g * sqrt(C)."""
    C = x.shape[1]
    x32 = x.astype(jnp.float32)
    norm = jnp.sqrt(jnp.sum(x32 * x32, axis=1, keepdims=True))
    xn = x32 / jnp.maximum(norm, eps)
    return (xn * g * (C ** 0.5)).astype(x.dtype)


if __name__ == "__main__":
    B, C, H, W = 2, 4, 16, 16

    key = jax.random.PRNGKey(0)
    kx, kg = jax.random.split(key)
    x = jax.random.normal(kx, (B, C, H, W), jnp.float32)
    # module initializes g to ones; perturb slightly so the affine path is tested
    g = 1.0 + 0.1 * jax.random.normal(kg, (1, C, 1, 1), jnp.float32)

    out = jax.block_until_ready(rms_norm(x, g))
    ref = jax.block_until_ready(_ref_rmsnorm(x, g))

    assert out.shape == (B, C, H, W)
    max_err = jnp.max(jnp.abs(out - ref))
    assert jnp.allclose(out, ref, atol=1e-4, rtol=1e-4), f"max abs err {max_err}"

    print("KERNEL_OK")
</pallas_src>

<mosaic_0001>
module attributes {stable_mosaic.version = 11 : i64} {
  func.func @_rmsnorm_kernel(%arg0: i32, %arg1: i32, %arg2: memref<1x4x256xf32, #tpu.memory_space<vmem>>, %arg3: memref<4x1xf32, #tpu.memory_space<vmem>>, %arg4: memref<1x4x256xf32, #tpu.memory_space<vmem>>) attributes {dimension_semantics = [#tpu.dimension_semantics<parallel>, #tpu.dimension_semantics<parallel>], iteration_bounds = array<i64: 2, 1>, scalar_prefetch = 0 : i64, scratch_operands = 0 : i64, tpu.core_type = #tpu.core_type<tc>, window_params = [{transform_indices = @transform_0, window_bounds = array<i64: 1, 4, 256>}, {pipeline_mode = #tpu.pipeline_mode<synchronous>, transform_indices = @transform_1, window_bounds = array<i64: 4, 1>}, {transform_indices = @transform_2, window_bounds = array<i64: 1, 4, 256>}]} {
    %c0 = arith.constant 0 : index
    %c0_0 = arith.constant 0 : index
    %c0_1 = arith.constant 0 : index
    %0 = vector.load %arg2[%c0, %c0_0, %c0_1] : memref<1x4x256xf32, #tpu.memory_space<vmem>>, vector<1x4x256xf32>
    %1 = vector.shape_cast %0 : vector<1x4x256xf32> to vector<4x256xf32>
    %2 = arith.mulf %1, %1 : vector<4x256xf32>
    %cst = arith.constant dense<0.000000e+00> : vector<256xf32>
    %3 = vector.multi_reduction <add>, %2, %cst [0] : vector<4x256xf32> to vector<256xf32>
    %4 = vector.shape_cast %3 : vector<256xf32> to vector<1x256xf32>
    %5 = math.sqrt %4 : vector<1x256xf32>
    %cst_2 = arith.constant 9.99999996E-13 : f32
    %6 = vector.broadcast %cst_2 : f32 to vector<1x256xf32>
    %7 = arith.maximumf %5, %6 : vector<1x256xf32>
    %8 = tpu.reciprocal %7 : vector<1x256xf32> -> vector<1x256xf32>
    %c0_3 = arith.constant 0 : index
    %c0_4 = arith.constant 0 : index
    %9 = vector.load %arg3[%c0_3, %c0_4] : memref<4x1xf32, #tpu.memory_space<vmem>>, vector<4x1xf32>
    %cst_5 = arith.constant 2.000000e+00 : f32
    %10 = vector.broadcast %cst_5 : f32 to vector<4x1xf32>
    %11 = arith.mulf %9, %10 : vector<4x1xf32>
    %12 = vector.broadcast %8 : vector<1x256xf32> to vector<4x256xf32>
    %13 = arith.mulf %1, %12 : vector<4x256xf32>
    %14 = vector.broadcast %11 : vector<4x1xf32> to vector<4x256xf32>
    %15 = arith.mulf %13, %14 : vector<4x256xf32>
    %c0_6 = arith.constant 0 : index
    %c0_7 = arith.constant 0 : index
    %c0_8 = arith.constant 0 : index
    %16 = vector.load %arg4[%c0_6, %c0_7, %c0_8] : memref<1x4x256xf32, #tpu.memory_space<vmem>>, vector<1x4x256xf32>
    %17 = vector.shape_cast %16 : vector<1x4x256xf32> to vector<4x256xf32>
    %18 = vector.shape_cast %15 : vector<4x256xf32> to vector<1x4x256xf32>
    tpu.vector_store %arg4[%c0_6, %c0_7, %c0_8], %18 {strides = array<i32>} : memref<1x4x256xf32, #tpu.memory_space<vmem>>, vector<1x4x256xf32>,
    return
  }
  func.func @transform_0(%arg0: i32, %arg1: i32) -> (i32, i32, i32) {
    %c0_i32 = arith.constant 0 : i32
    %c0_i32_0 = arith.constant 0 : i32
    return %arg0, %c0_i32, %arg1 : i32, i32, i32
  }
  func.func @transform_1(%arg0: i32, %arg1: i32) -> (i32, i32) {
    %c0_i32 = arith.constant 0 : i32
    %c0_i32_0 = arith.constant 0 : i32
    %c0_i32_1 = arith.constant 0 : i32
    return %c0_i32, %c0_i32_0 : i32, i32
  }
  func.func @transform_2(%arg0: i32, %arg1: i32) -> (i32, i32, i32) {
    %c0_i32 = arith.constant 0 : i32
    %c0_i32_0 = arith.constant 0 : i32
    return %arg0, %c0_i32, %arg1 : i32, i32, i32
  }
}

</mosaic_0001>

<bundles_post_ra>
// kernel: rms_norm.1
= control target key start
LH: loop header
LB: loop body
LE: loop exit
PB: predicated region body
PF: predicated region fallthrough
CT: control target
= control target key end

     0   :  { %s418_s9 = smov 0   ;;  %s420_s10 = smov 0   ;;  %s461_s0 = inlined_call_operand.vmem [shape: f32[2,4,256], index: 0, kind: input, shape index: {}]   ;;  %s462_s1 = inlined_call_operand.vmem [shape: f32[4,1], index: 1, kind: input, shape index: {}]   ;;  %s463_s2 = inlined_call_operand.vmem [shape: f32[2,4,256], index: 2, kind: output, shape index: {}]  }
   0x1   :  { %s422_s11 = smov 0  }
   0x2 LB: > { %s24_s12 = sadd.s32 1, %s395_s10  ;;  %p333_p0 = scmp.ge.s32.totalorder %s399_s11, 1  ;;  %s399_s11 = sphi %s422_s11, %s12_s11   ;;  %s395_s10 = sphi %s420_s10, %s465_s10   ;;  %s391_s9 = sphi %s418_s9, %s464_s9  }
   0x3   : > { %p26_p1 = scmp.ge.s32.totalorder %s24_s12, 2  ;;  %p133_p2 = scmp.lt.s32.totalorder %s399_s11, 3 }
   0x5   : > { %s467_s12 = smov (%p26_p1, %s24_s12), 0  ;;  %p134_p3 = pnand %p333_p0, %p133_p2 }
   0x6   : > { %v221_v0 = vld [vmem:[%s462_s1] sm:$0xf] (!%p134_p3)  ;;  %v401_v1 = vmov (!%p134_p3), 0   ;;  %p164_p4 = scmp.lt.s32.totalorder (!%p134_p3), %s391_s9, 1  ;;  %vm188_vm0 = vcmask (!%p134_p3), 1043456   ;;  %v235_v34 = vlaneseq (!%p134_p3) }
   0x7   : > { %137 = sbr.rel (%p134_p3) target bundleno = 142 (0x8e), region = 28  ;;  %368 = vset.pattern.permute.xlu0 (!%p134_p3), %v401_v1  ;;  %v222_v2 = vmul.f32 (!%p134_p3), 2.0, %v221_v0  ;;  %v402_v32 = vmov (!%p134_p3), 839922192  }
   0x8   : > { %v233_v33 = vunpack.c.l.s4 (!%p134_p3), %v402_v32  ;;  %v236_v38 = vshrl.u32 (!%p134_p3), %v235_v34, 7 }
   0x9   : > { %230 = vperm.xlu0 (!%p134_p3), %368, %v222_v2  }
   0xa   : > { %v234_v37 = vunpack.c.0.s8 (!%p134_p3), %v233_v33 }
   0xc   : > { %v237_v40 = vsub.s32 (!%p134_p3), %v234_v37, %v236_v38 }
   0xe   : > { %s469_s9 = smov (!%p164_p4, %s391_s9), 1 }
   0xf   : > { %s340_s15 = sshll.u32 %s469_s9, 3 }
  0x10   : > { %s171_s18 = scalar_lea.vmem %s461_s0, %s340_s15  ;;  %s181_s21 = scalar_lea.vmem %s463_s2, %s340_s15 }
  0x11   : > { %v183_v3 = vld [vmem:[%s171_s18] sm:$0xff] }
  0x12   : > { %v184_v4 = vmul.f32 %v183_v3, %v183_v3 }
  0x14   : > { %v186_v5 = vcombine.high %v184_v4, %v184_v4  ;;  %v189_v6 = vsel %vm188_vm0, %v184_v4, 0.0 }
  0x15   : > { %v190_v8 = vrot.slane %v189_v6, 4 }
  0x16   : > { %v196_v7 = vsel %vm188_vm0, %v186_v5, 0.0 }
  0x17   : > { %v197_v9 = vrot.slane %v196_v7, 4  ;;  %v191_v10 = vadd.f32 %v190_v8, %v189_v6 }
  0x19   : > { %v198_v11 = vadd.f32 %v197_v9, %v196_v7  ;;  %v192_v12 = vrot.slane %v191_v10, 2 }
  0x1b   : > { %v199_v13 = vrot.slane %v198_v11, 2  ;;  %v193_v14 = vadd.f32 %v192_v12, %v191_v10 }
  0x1d   : > { %v200_v15 = vadd.f32 %v199_v13, %v198_v11  ;;  %v194_v16 = vrot.slane %v193_v14, 1 }
  0x1f   : > { %v201_v17 = vrot.slane %v200_v15, 1  ;;  %v195_v18 = vadd.f32 %v194_v16, %v193_v14 }
  0x21   : > { %v202_v19 = vadd.f32 %v201_v17, %v200_v15  ;;  %369 = vrsqrt.f32 %v195_v18  ;;  %vm205_vm1 = vcmp.eq.f32.partialorder %v195_v18, inf  ;;  %v208_v24 = vand.u32 2147483648, %v195_v18 }
  0x22   : > { %vm207_vm3 = vcmp.eq.f32.partialorder %v195_v18, 0.0 }
  0x23   : > { %371 = vrsqrt.f32 %v202_v19  ;;  %vm212_vm2 = vcmp.eq.f32.partialorder %v202_v19, inf  ;;  %v215_v26 = vand.u32 2147483648, %v202_v19  ;;  %vm214_vm4 = vcmp.eq.f32.partialorder %v202_v19, 0.0 }
  0x2b   : > { %v370_v20 = vpop.eup %369 }
  0x2c   : > { %v204_v22 = vmul.f32 %v370_v20, %v195_v18 }
  0x2d   : > { %v372_v21 = vpop.eup %371 }
  0x2e   : > { %v211_v23 = vmul.f32 %v372_v21, %v202_v19  ;;  %v206_v25 = vsel %vm205_vm1, %v195_v18, %v204_v22 }
  0x2f   : > { %v209_v28 = vsel %vm207_vm3, %v208_v24, %v206_v25 }
  0x30   : > { %v213_v27 = vsel %vm212_vm2, %v202_v19, %v211_v23  ;;  %v217_v30 = vmax.f32 %v209_v28, 1e-12 }
  0x31   : > { %v216_v29 = vsel %vm214_vm4, %v215_v26, %v213_v27 }
  0x32   : > { %v218_v31 = vmax.f32 %v216_v29, 1e-12  ;;  %373 = vrcp.f32 %v217_v30 }
  0x34   : > { %375 = vrcp.f32 %v218_v31 }
  0x3c   : > { %v374_v35 = vpop.eup %373 }
  0x3e   : > { %v376_v36 = vpop.eup %375 }
  0x3f   : > { %v225_v39 = vcombine.low %v374_v35, %v376_v36 }
  0x41   : > { %v227_v41 = vmul.f32 %v225_v39, %v183_v3 }
  0x88   : > { %v231_v42 = vpop.permute.xlu0 %230 }
  0x89   : > { %v238_v43 = vrot.slane %v231_v42, %v237_v40 }
  0x8b   : > { %v240_v44 = vmul.f32 %v238_v43, %v227_v41 }
  0x8d   : > { %241 = vst [vmem:[%s181_s21] sm:$0xff] %v240_v44 }
  0x8e PF: > { %s12_s11 = sadd.s32 1, %s399_s11   ;;  %s464_s9 = smov %s395_s10 }
  0x8f   : > { %p9_p5 = scmp.ge.s32.totalorder %s12_s11, 4   ;;  %s465_s10 = smov %s467_s12 }
  0x91   :  { %11 = sbr.rel (!%p9_p5) target bundleno = 2 (0x2), region = 58 }

</bundles_post_ra>
